<compile_context>
chip_gen: v5e
topology: v5e:2x2
jax: 0.10.0
libtpu: 0.0.40
codegen_flags: <defaults>
</compile_context>

<pallas_src>
import jax
import jax.numpy as jnp
from jax.experimental import pallas as pl
from jax.experimental.pallas import tpu as pltpu

SPRING_K = 1.0    # synthetic, time-independent experiment
LANE = 128        # TPU lane width
TR_MAX = 2048     # rows (lanes) per grid step; per-tile VMEM live set is a few 100 KiB


def _round_up(x, n):
    return ((x + n - 1) // n) * n


def _hvv_kernel(t_ref, dt_ref, q_ref, p_ref, invm_ref,
                w1_ref, b1_ref, w2q_ref, b2q_ref, w2p_ref, b2p_ref,
                qo_ref, po_ref):
    # State tensors are lane-major: (D, TR) with the B*N rows on the lane axis.
    dt = dt_ref[0]
    _ = t_ref[0]                      # experiment is time-independent; kept for API parity

    q = q_ref[...]                    # (D, TR)
    p = p_ref[...]
    inv_m = invm_ref[...]             # pre-broadcast 1/m, same shape (no divide in-kernel)

    # experiment(q, p, m, t) before the base step
    dq1 = p * inv_m
    dp1 = -SPRING_K * q

    # base(): velocity Verlet.  dp(q, p) == dp1, so it is reused (no recompute).
    half_dt = 0.5 * dt
    p1 = p + dp1 * half_dt
    q1 = q + (p1 * inv_m) * dt        # experiment.shift = identity
    dp_b = -SPRING_K * q1
    p2 = p1 + dp_b * half_dt

    # experiment(q, p, m, t) after the base step; dp only depends on q1 -> dp2 == dp_b
    dq2 = p2 * inv_m
    dp2 = dp_b

    # hypersolver MLP over concat([dq1, dq2, dp1, dp2]).  Feature axis lives on the
    # sublanes; rows stay lane-dense.  f32 operands, f32 MXU accumulation.
    feat = jnp.concatenate([dq1, dq2, dp1, dp2], axis=0)                        # (4D, TR)
    h = jnp.tanh(jnp.dot(w1_ref[...], feat,
                         preferred_element_type=jnp.float32) + b1_ref[...])     # (H, TR)
    hq = jnp.dot(w2q_ref[...], h, preferred_element_type=jnp.float32) + b2q_ref[...]  # (D, TR)
    hp = jnp.dot(w2p_ref[...], h, preferred_element_type=jnp.float32) + b2p_ref[...]  # (D, TR)

    dt3 = dt * dt * dt                # dt ** (order + 1), order = 2
    qo_ref[...] = q1 + hq * dt3       # shift = identity
    po_ref[...] = p2 + hp * dt3


@jax.jit
def hyper_velocity_verlet(q, p, m, t, dt, params):
    """Single HyperVelocityVerlet forward step. q, p: (B, N, D); m: (B, N, 1)."""
    B, N, D = q.shape
    R = B * N
    H = params[0].shape[1]

    # Lane-dense layout: rows on the 128-wide lane axis, padded to the tile size.
    r128 = _round_up(R, LANE)
    TR = min(TR_MAX, r128)
    R_pad = _round_up(r128, TR)
    pad = R_pad - R

    def to_lane_major(x):             # (B, N, D) -> (D, R_pad), zero-padded columns
        xt = x.reshape(R, D).astype(jnp.float32).T
        return jnp.pad(xt, ((0, 0), (0, pad)))

    qT = to_lane_major(q)
    pT = to_lane_major(p)
    invmT = to_lane_major(jnp.broadcast_to(1.0 / m.astype(jnp.float32), (B, N, D)))

    w1, b1, w2, b2 = params           # (4D,H), (1,H), (H,2D), (1,2D)
    w1T = w1.astype(jnp.float32).T               # (H, 4D)
    b1T = b1.astype(jnp.float32).T               # (H, 1)
    w2qT = w2[:, :D].astype(jnp.float32).T       # (D, H)   -> no in-kernel lane slicing
    w2pT = w2[:, D:].astype(jnp.float32).T       # (D, H)
    b2qT = b2[:, :D].astype(jnp.float32).T       # (D, 1)
    b2pT = b2[:, D:].astype(jnp.float32).T       # (D, 1)

    t_arr = jnp.asarray(t, jnp.float32).reshape(1)
    dt_arr = jnp.asarray(dt, jnp.float32).reshape(1)

    grid = (R_pad // TR,)
    row_spec = lambda: pl.BlockSpec((D, TR), lambda i: (0, i))
    full_spec = lambda shape: pl.BlockSpec(shape, lambda i: (0, 0))
    smem_spec = lambda: pl.BlockSpec(memory_space=pltpu.MemorySpace.SMEM)

    flops = 2 * R_pad * (4 * D * H + H * 2 * D) + 30 * R_pad * D
    bytes_accessed = (5 * R_pad * D * 4
                      + 4 * (w1T.size + w2qT.size + w2pT.size)
                      + 4 * (b1T.size + b2qT.size + b2pT.size))

    qoT, poT = pl.pallas_call(
        _hvv_kernel,
        grid=grid,
        out_shape=(jax.ShapeDtypeStruct((D, R_pad), jnp.float32),
                   jax.ShapeDtypeStruct((D, R_pad), jnp.float32)),
        in_specs=[smem_spec(), smem_spec(),                    # t, dt scalars in SMEM
                  row_spec(), row_spec(), row_spec(),          # q, p, 1/m (row-tiled)
                  full_spec((H, 4 * D)), full_spec((H, 1)),    # MLP layer 1
                  full_spec((D, H)), full_spec((D, 1)),        # MLP layer 2 (q head)
                  full_spec((D, H)), full_spec((D, 1))],       # MLP layer 2 (p head)
        out_specs=(row_spec(), row_spec()),
        input_output_aliases={2: 0, 3: 1},                     # q -> qo, p -> po
        compiler_params=pltpu.CompilerParams(
            dimension_semantics=("parallel",),
            vmem_limit_bytes=32 * 1024 * 1024),
        cost_estimate=pl.CostEstimate(
            flops=flops, transcendentals=R_pad * H, bytes_accessed=bytes_accessed),
    )(t_arr, dt_arr, qT, pT, invmT, w1T, b1T, w2qT, b2qT, w2pT, b2pT)

    qo = qoT[:, :R].T.reshape(B, N, D)
    po = poT[:, :R].T.reshape(B, N, D)
    return qo, po


def _reference_f32(q, p, m, t, dt, params):
    """Pure-f32 JAX reference of the module forward (semantic check)."""
    w1, b1, w2, b2 = params
    D = q.shape[-1]
    dq_fn = lambda q_, p_: p_ / m
    dp_fn = lambda q_, p_: -SPRING_K * q_
    dq1, dp1 = dq_fn(q, p), dp_fn(q, p)
    p1 = p + 0.5 * dp_fn(q, p) * dt
    q1 = q + dq_fn(q, p1) * dt
    p2 = p1 + 0.5 * dp_fn(q1, p1) * dt
    dq2, dp2 = dq_fn(q1, p2), dp_fn(q1, p2)
    feat = jnp.concatenate([dq1, dq2, dp1, dp2], axis=-1)
    h = jnp.tanh(feat @ w1 + b1)
    out = h @ w2 + b2
    hq, hp = out[..., :D], out[..., D:]
    return q1 + hq * dt ** 3, p2 + hp * dt ** 3


if __name__ == "__main__":
    key = jax.random.PRNGKey(0)
    B, N, D, H = 2, 8, 4, 32
    k1, k2, k3, k4, k5 = jax.random.split(key, 5)

    q = jax.random.normal(k1, (B, N, D), jnp.float32)
    p = jax.random.normal(k2, (B, N, D), jnp.float32)
    m = jax.random.uniform(k3, (B, N, 1), jnp.float32, minval=0.5, maxval=2.0)

    # deterministic hypersolver parameters (synthetic, not a checkpoint)
    w1 = jax.random.normal(k4, (4 * D, H), jnp.float32) * 0.1
    b1 = jnp.zeros((1, H), jnp.float32)
    w2 = jax.random.normal(k5, (H, 2 * D), jnp.float32) * 0.1
    b2 = jnp.zeros((1, 2 * D), jnp.float32)
    params = (w1, b1, w2, b2)

    t, dt = 0.0, 0.1

    q_out, p_out = hyper_velocity_verlet(q, p, m, t, dt, params)
    jax.block_until_ready((q_out, p_out))

    # Kernel is f32 end-to-end -> tight check vs the pure-f32 module forward.
    q_ref, p_ref = _reference_f32(q, p, m, t, dt, params)
    assert jnp.allclose(q_out, q_ref, atol=1e-5), "q mismatch vs f32 reference"
    assert jnp.allclose(p_out, p_ref, atol=1e-5), "p mismatch vs f32 reference"

    print("KERNEL_OK")
</pallas_src>

<mosaic_0001>
module attributes {stable_mosaic.version = 11 : i64} {
  func.func @_hvv_kernel(%arg0: i32, %arg1: memref<1xf32, #tpu.memory_space<smem>>, %arg2: memref<1xf32, #tpu.memory_space<smem>>, %arg3: memref<4x128xf32, #tpu.memory_space<vmem>>, %arg4: memref<4x128xf32, #tpu.memory_space<vmem>>, %arg5: memref<4x128xf32, #tpu.memory_space<vmem>>, %arg6: memref<32x16xf32, #tpu.memory_space<vmem>>, %arg7: memref<32x1xf32, #tpu.memory_space<vmem>>, %arg8: memref<4x32xf32, #tpu.memory_space<vmem>>, %arg9: memref<4x1xf32, #tpu.memory_space<vmem>>, %arg10: memref<4x32xf32, #tpu.memory_space<vmem>>, %arg11: memref<4x1xf32, #tpu.memory_space<vmem>>, %arg12: memref<4x128xf32, #tpu.memory_space<vmem>>, %arg13: memref<4x128xf32, #tpu.memory_space<vmem>>) attributes {dimension_semantics = [#tpu.dimension_semantics<parallel>], iteration_bounds = array<i64: 1>, scalar_prefetch = 0 : i64, scratch_operands = 0 : i64, tpu.core_type = #tpu.core_type<tc>, window_params = [{transform_indices = @transform_0, window_bounds = array<i64: 1>}, {transform_indices = @transform_1, window_bounds = array<i64: 1>}, {transform_indices = @transform_2, window_bounds = array<i64: 4, 128>}, {transform_indices = @transform_3, window_bounds = array<i64: 4, 128>}, {transform_indices = @transform_4, window_bounds = array<i64: 4, 128>}, {pipeline_mode = #tpu.pipeline_mode<synchronous>, transform_indices = @transform_5, window_bounds = array<i64: 32, 16>}, {pipeline_mode = #tpu.pipeline_mode<synchronous>, transform_indices = @transform_6, window_bounds = array<i64: 32, 1>}, {pipeline_mode = #tpu.pipeline_mode<synchronous>, transform_indices = @transform_7, window_bounds = array<i64: 4, 32>}, {pipeline_mode = #tpu.pipeline_mode<synchronous>, transform_indices = @transform_8, window_bounds = array<i64: 4, 1>}, {pipeline_mode = #tpu.pipeline_mode<synchronous>, transform_indices = @transform_9, window_bounds = array<i64: 4, 32>}, {pipeline_mode = #tpu.pipeline_mode<synchronous>, transform_indices = @transform_10, window_bounds = array<i64: 4, 1>}, {transform_indices = @transform_11, window_bounds = array<i64: 4, 128>}, {transform_indices = @transform_12, window_bounds = array<i64: 4, 128>}]} {
    %c0 = arith.constant 0 : index
    %0 = memref.load %arg2[%c0] : memref<1xf32, #tpu.memory_space<smem>>
    %c0_0 = arith.constant 0 : index
    %c0_1 = arith.constant 0 : index
    %1 = vector.load %arg3[%c0_0, %c0_1] : memref<4x128xf32, #tpu.memory_space<vmem>>, vector<4x128xf32>
    %c0_2 = arith.constant 0 : index
    %c0_3 = arith.constant 0 : index
    %2 = vector.load %arg4[%c0_2, %c0_3] : memref<4x128xf32, #tpu.memory_space<vmem>>, vector<4x128xf32>
    %c0_4 = arith.constant 0 : index
    %c0_5 = arith.constant 0 : index
    %3 = vector.load %arg5[%c0_4, %c0_5] : memref<4x128xf32, #tpu.memory_space<vmem>>, vector<4x128xf32>
    %4 = arith.mulf %2, %3 : vector<4x128xf32>
    %cst = arith.constant -1.000000e+00 : f32
    %5 = vector.broadcast %cst : f32 to vector<4x128xf32>
    %6 = arith.mulf %5, %1 : vector<4x128xf32>
    %cst_6 = arith.constant 5.000000e-01 : f32
    %7 = arith.mulf %cst_6, %0 : f32
    %8 = vector.broadcast %7 : f32 to vector<4x128xf32>
    %9 = arith.mulf %6, %8 : vector<4x128xf32>
    %10 = arith.addf %2, %9 : vector<4x128xf32>
    %11 = arith.mulf %10, %3 : vector<4x128xf32>
    %12 = vector.broadcast %0 : f32 to vector<4x128xf32>
    %13 = arith.mulf %11, %12 : vector<4x128xf32>
    %14 = arith.addf %1, %13 : vector<4x128xf32>
    %cst_7 = arith.constant -1.000000e+00 : f32
    %15 = vector.broadcast %cst_7 : f32 to vector<4x128xf32>
    %16 = arith.mulf %15, %14 : vector<4x128xf32>
    %17 = vector.broadcast %7 : f32 to vector<4x128xf32>
    %18 = arith.mulf %16, %17 : vector<4x128xf32>
    %19 = arith.addf %10, %18 : vector<4x128xf32>
    %20 = arith.mulf %19, %3 : vector<4x128xf32>
    %21 = tpu.concatenate %4, %20, %6, %16 in 0 : vector<4x128xf32>, vector<4x128xf32>, vector<4x128xf32>, vector<4x128xf32> -> vector<16x128xf32>
    %c0_8 = arith.constant 0 : index
    %c0_9 = arith.constant 0 : index
    %22 = vector.load %arg6[%c0_8, %c0_9] : memref<32x16xf32, #tpu.memory_space<vmem>>, vector<32x16xf32>
    %cst_10 = arith.constant dense<0.000000e+00> : vector<32x128xf32>
    %23 = tpu.matmul %22, %21, %cst_10 {dimension_numbers = #tpu.dot_dimension_numbers<[1], [0], [0], [1], [0, 0, 1, 1], [], []>} : vector<32x16xf32>, vector<16x128xf32>, vector<32x128xf32> -> vector<32x128xf32>
    %c0_11 = arith.constant 0 : index
    %c0_12 = arith.constant 0 : index
    %24 = vector.load %arg7[%c0_11, %c0_12] : memref<32x1xf32, #tpu.memory_space<vmem>>, vector<32x1xf32>
    %25 = vector.broadcast %24 : vector<32x1xf32> to vector<32x128xf32>
    %26 = arith.addf %23, %25 : vector<32x128xf32>
    %27 = math.tanh %26 : vector<32x128xf32>
    %c0_13 = arith.constant 0 : index
    %c0_14 = arith.constant 0 : index
    %28 = vector.load %arg8[%c0_13, %c0_14] : memref<4x32xf32, #tpu.memory_space<vmem>>, vector<4x32xf32>
    %cst_15 = arith.constant dense<0.000000e+00> : vector<4x128xf32>
    %29 = tpu.matmul %28, %27, %cst_15 {dimension_numbers = #tpu.dot_dimension_numbers<[1], [0], [0], [1], [0, 0, 1, 1], [], []>} : vector<4x32xf32>, vector<32x128xf32>, vector<4x128xf32> -> vector<4x128xf32>
    %c0_16 = arith.constant 0 : index
    %c0_17 = arith.constant 0 : index
    %30 = vector.load %arg9[%c0_16, %c0_17] : memref<4x1xf32, #tpu.memory_space<vmem>>, vector<4x1xf32>
    %31 = vector.broadcast %30 : vector<4x1xf32> to vector<4x128xf32>
    %32 = arith.addf %29, %31 : vector<4x128xf32>
    %c0_18 = arith.constant 0 : index
    %c0_19 = arith.constant 0 : index
    %33 = vector.load %arg10[%c0_18, %c0_19] : memref<4x32xf32, #tpu.memory_space<vmem>>, vector<4x32xf32>
    %cst_20 = arith.constant dense<0.000000e+00> : vector<4x128xf32>
    %34 = tpu.matmul %33, %27, %cst_20 {dimension_numbers = #tpu.dot_dimension_numbers<[1], [0], [0], [1], [0, 0, 1, 1], [], []>} : vector<4x32xf32>, vector<32x128xf32>, vector<4x128xf32> -> vector<4x128xf32>
    %c0_21 = arith.constant 0 : index
    %c0_22 = arith.constant 0 : index
    %35 = vector.load %arg11[%c0_21, %c0_22] : memref<4x1xf32, #tpu.memory_space<vmem>>, vector<4x1xf32>
    %36 = vector.broadcast %35 : vector<4x1xf32> to vector<4x128xf32>
    %37 = arith.addf %34, %36 : vector<4x128xf32>
    %38 = arith.mulf %0, %0 : f32
    %39 = arith.mulf %38, %0 : f32
    %40 = vector.broadcast %39 : f32 to vector<4x128xf32>
    %41 = arith.mulf %32, %40 : vector<4x128xf32>
    %42 = arith.addf %14, %41 : vector<4x128xf32>
    %c0_23 = arith.constant 0 : index
    %c0_24 = arith.constant 0 : index
    %43 = vector.load %arg12[%c0_23, %c0_24] : memref<4x128xf32, #tpu.memory_space<vmem>>, vector<4x128xf32>
    tpu.vector_store %arg12[%c0_23, %c0_24], %42 {strides = array<i32>} : memref<4x128xf32, #tpu.memory_space<vmem>>, vector<4x128xf32>,
    %44 = vector.broadcast %39 : f32 to vector<4x128xf32>
    %45 = arith.mulf %37, %44 : vector<4x128xf32>
    %46 = arith.addf %19, %45 : vector<4x128xf32>
    %c0_25 = arith.constant 0 : index
    %c0_26 = arith.constant 0 : index
    %47 = vector.load %arg13[%c0_25, %c0_26] : memref<4x128xf32, #tpu.memory_space<vmem>>, vector<4x128xf32>
    tpu.vector_store %arg13[%c0_25, %c0_26], %46 {strides = array<i32>} : memref<4x128xf32, #tpu.memory_space<vmem>>, vector<4x128xf32>,
    return
  }
  func.func @transform_0(%arg0: i32) -> i32 {
    %c0_i32 = arith.constant 0 : i32
    %c0_i32_0 = arith.constant 0 : i32
    return %c0_i32 : i32
  }
  func.func @transform_1(%arg0: i32) -> i32 {
    %c0_i32 = arith.constant 0 : i32
    %c0_i32_0 = arith.constant 0 : i32
    return %c0_i32 : i32
  }
  func.func @transform_2(%arg0: i32) -> (i32, i32) {
    %c0_i32 = arith.constant 0 : i32
    %c0_i32_0 = arith.constant 0 : i32
    return %c0_i32, %arg0 : i32, i32
  }
  func.func @transform_3(%arg0: i32) -> (i32, i32) {
    %c0_i32 = arith.constant 0 : i32
    %c0_i32_0 = arith.constant 0 : i32
    return %c0_i32, %arg0 : i32, i32
  }
  func.func @transform_4(%arg0: i32) -> (i32, i32) {
    %c0_i32 = arith.constant 0 : i32
    %c0_i32_0 = arith.constant 0 : i32
    return %c0_i32, %arg0 : i32, i32
  }
  func.func @transform_5(%arg0: i32) -> (i32, i32) {
    %c0_i32 = arith.constant 0 : i32
    %c0_i32_0 = arith.constant 0 : i32
    %c0_i32_1 = arith.constant 0 : i32
    return %c0_i32, %c0_i32_0 : i32, i32
  }
  func.func @transform_6(%arg0: i32) -> (i32, i32) {
    %c0_i32 = arith.constant 0 : i32
    %c0_i32_0 = arith.constant 0 : i32
    %c0_i32_1 = arith.constant 0 : i32
    return %c0_i32, %c0_i32_0 : i32, i32
  }
  func.func @transform_7(%arg0: i32) -> (i32, i32) {
    %c0_i32 = arith.constant 0 : i32
    %c0_i32_0 = arith.constant 0 : i32
    %c0_i32_1 = arith.constant 0 : i32
    return %c0_i32, %c0_i32_0 : i32, i32
  }
  func.func @transform_8(%arg0: i32) -> (i32, i32) {
    %c0_i32 = arith.constant 0 : i32
    %c0_i32_0 = arith.constant 0 : i32
    %c0_i32_1 = arith.constant 0 : i32
    return %c0_i32, %c0_i32_0 : i32, i32
  }
  func.func @transform_9(%arg0: i32) -> (i32, i32) {
    %c0_i32 = arith.constant 0 : i32
    %c0_i32_0 = arith.constant 0 : i32
    %c0_i32_1 = arith.constant 0 : i32
    return %c0_i32, %c0_i32_0 : i32, i32
  }
  func.func @transform_10(%arg0: i32) -> (i32, i32) {
    %c0_i32 = arith.constant 0 : i32
    %c0_i32_0 = arith.constant 0 : i32
    %c0_i32_1 = arith.constant 0 : i32
    return %c0_i32, %c0_i32_0 : i32, i32
  }
  func.func @transform_11(%arg0: i32) -> (i32, i32) {
    %c0_i32 = arith.constant 0 : i32
    %c0_i32_0 = arith.constant 0 : i32
    return %c0_i32, %arg0 : i32, i32
  }
  func.func @transform_12(%arg0: i32) -> (i32, i32) {
    %c0_i32 = arith.constant 0 : i32
    %c0_i32_0 = arith.constant 0 : i32
    return %c0_i32, %arg0 : i32, i32
  }
}

</mosaic_0001>

<bundles_post_ra>
// kernel: hyper_velocity_verlet.1
= control target key start
LH: loop header
LB: loop body
LE: loop exit
PB: predicated region body
PF: predicated region fallthrough
CT: control target
= control target key end

     0   :  { %v241_v1 = vmov 0   ;;  %vm66_vm0 = vcmask 1043456   ;;  %vm97_vm1 = vcmask 130048   ;;  %vm150_vm2 = vcmask 261120   ;;  %s379_s1 = inlined_call_operand.<no memory space> [shape: f32[1], index: 1, kind: input, shape index: {}]   ;;  %s380_s2 = inlined_call_operand.vmem [shape: f32[4,128], index: 2, kind: input, shape index: {}, may-alias: {2,11}]   ;;  %s381_s0 = inlined_call_operand.<no memory space> [shape: f32[1], index: 0, kind: input, shape index: {}]   ;;  %s382_s6 = inlined_call_operand.vmem [shape: f32[32,1], index: 6, kind: input, shape index: {}]   ;;  %s383_s3 = inlined_call_operand.vmem [shape: f32[4,128], index: 3, kind: input, shape index: {}, may-alias: {3,12}]   ;;  %s384_s4 = inlined_call_operand.vmem [shape: f32[4,128], index: 4, kind: input, shape index: {}]   ;;  %s385_s5 = inlined_call_operand.vmem [shape: f32[32,16], index: 5, kind: input, shape index: {}]   ;;  %s386_s8 = inlined_call_operand.vmem [shape: f32[4,1], index: 8, kind: input, shape index: {}]   ;;  %s387_s10 = inlined_call_operand.vmem [shape: f32[4,1], index: 10, kind: input, shape index: {}]   ;;  %s388_s7 = inlined_call_operand.vmem [shape: f32[4,32], index: 7, kind: input, shape index: {}]   ;;  %s389_s9 = inlined_call_operand.vmem [shape: f32[4,32], index: 9, kind: input, shape index: {}]   ;;  %s390_s11 = inlined_call_operand.vmem [shape: f32[4,128], index: 11, kind: output, shape index: {0}, may-alias: {2,11}]   ;;  %s391_s12 = inlined_call_operand.vmem [shape: f32[4,128], index: 12, kind: output, shape index: {1}, may-alias: {3,12}]  }
   0x1   :  { %v43_v0 = vld [vmem:[%s380_s2] sm:$0xf]  ;;  %230 = vset.pattern.permute.xlu0 %v241_v1  ;;  %231 = vset.pattern.permute.xlu1 %v241_v1  ;;  %s48_s24 = smul.f32 0.5, %s379_s1  ;;  %v76_v3 = vld [vmem:[%s382_s6 + $0x18] sm:$0xff]  ;;  %v74_v4 = vld [vmem:[%s382_s6 + $0x8] sm:$0xff]  ;;  %v53_v10 = vstv %s379_s1 }
   0x2   :  { %v47_v2 = vmul.f32 -1.0, %v43_v0  ;;  %232 = vset.pattern.permute.xlu2 %v241_v1  ;;  %v44_v5 = vld [vmem:[%s383_s3] sm:$0xf]  ;;  %94 = vperm.xlu0 %230, %v76_v3   ;;  %v75_v12 = vld [vmem:[%s382_s6 + $0x10] sm:$0xff]  ;;  %v72_v27 = vld [vmem:[%s385_s5 + $0x18] sm:$0xff]  ;;  %s204_s2 = smul.f32 %s379_s1, %s379_s1 }
   0x3   :  { %v49_v6 = vstv %s48_s24  ;;  %84 = vperm.xlu1 %231, %v74_v4   ;;  %v45_v8 = vld [vmem:[%s384_s4] sm:$0xf]  ;;  %v71_v24 = vld [vmem:[%s385_s5 + $0x10] sm:$0xff]  ;;  %v70_v28 = vld [vmem:[%s385_s5 + $0x8] sm:$0xff] }
   0x4   :  { %v50_v7 = vmul.f32 %v49_v6, %v47_v2  ;;  %v73_v13 = vld [vmem:[%s382_s6] sm:$0xff]  ;;  %v46_v21 = vmul.f32 %v45_v8, %v44_v5 }
   0x5   :  { %v69_v25 = vld [vmem:[%s385_s5] sm:$0xff] }
   0x6   :  { %v51_v9 = vadd.f32 %v50_v7, %v44_v5  ;;  %v144_v29 = vld [vmem:[%s386_s8] sm:$0xf] }
   0x7   :  { %147 = vperm.xlu2 %232, %v144_v29   ;;  %v175_v32 = vld [vmem:[%s387_s10] sm:$0xf] }
   0x8   :  { %v52_v11 = vmul.f32 %v51_v9, %v45_v8  ;;  %v143_v46 = vld [vmem:[%s388_s7] sm:$0xf]  ;;  %s205_s7 = smul.f32 %s204_s2, %s379_s1 }
   0x9   :  { %v174_v47 = vld [vmem:[%s389_s9] sm:$0xf] }
   0xa   :  { %v54_v14 = vmul.f32 %v53_v10, %v52_v11  ;;  %89 = vperm.xlu0 %230, %v75_v12   ;;  %v206_v51 = vstv %s205_s7 }
   0xb   :  { %79 = vperm.xlu1 %231, %v73_v13  }
   0xc   :  { %v334_v15 = vadd.f32 %v54_v14, %v43_v0 }
   0xe   :  { %v56_v16 = vmul.f32 -1.0, %v334_v15 }
   0xf   :  { %178 = vperm.xlu2 %232, %v175_v32  }
  0x10   :  { %v57_v17 = vmul.f32 %v56_v16, %v49_v6  ;;  %v64_v18 = vrot.slane %v56_v16, 4 }
  0x12   :  { %v68_v19 = vsel %vm66_vm0, %v47_v2, %v64_v18  ;;  %v337_v20 = vadd.f32 %v57_v17, %v51_v9 }
  0x13   :  { %227 = vmatpush.msra.mxu3 %v68_v19  ;;  %124 = vmatpush.msra.mxu0 %v68_v19 }
  0x14   :  { %v59_v22 = vmul.f32 %v337_v20, %v45_v8 }
  0x16   :  { %v61_v23 = vrot.slane %v59_v22, 4 }
  0x18   :  { %v67_v26 = vsel %vm66_vm0, %v46_v21, %v61_v23 }
  0x19   :  { %228 = vmatpush.msra.mxu3 %v67_v26  ;;  %125 = vmatpush.msra.mxu0 %v67_v26 }
  0x1a   :  { %223 = vmatmul.msk.f32.vlgmr.msra.gmra.mxu3 %vm97_vm1, %v71_v24  ;;  %221 = vmatmul.msk.f32.vlgmr.msra.gmra.mxu0 %vm97_vm1, %v69_v25 }
  0x22   :  { %224 = vmatmul.msk.f32.gmra.mxu3 %vm97_vm1, %v72_v27  ;;  %222 = vmatmul.msk.f32.gmra.mxu0 %vm97_vm1, %v70_v28 }
  0x61   :  { %v148_v49 = vpop.permute.xlu2 %147 }
  0x69   :  { %v179_v55 = vpop.permute.xlu2 %178 }
  0x74   :  { %v95_v30 = vpop.permute.xlu0 %94 }
  0x75   :  { %v85_v33 = vpop.permute.xlu1 %84 }
  0x7c   :  { %v90_v35 = vpop.permute.xlu0 %89 }
  0x7d   :  { %v80_v40 = vpop.permute.xlu1 %79 }
  0x97   :  { %v127_v31 = vpop.f32.mrf.mxu0 }
  0x98   :  { %v128_v42 = vadd.f32 %v127_v31, %v80_v40 }
  0x9d   :  { %v133_v34 = vpop.f32.mrf.mxu3 }
  0x9e   :  { %v134_v38 = vadd.f32 %v133_v34, %v90_v35 }
  0x9f   :  { %v130_v36 = vpop.f32.mrf.mxu0 }
  0xa0   :  { %v131_v41 = vadd.f32 %v130_v36, %v85_v33 }
  0xa5   :  { %v136_v37 = vpop.f32.mrf.mxu3 }
  0xa6   :  { %v137_v39 = vadd.f32 %v136_v37, %v95_v30 }
  0xa8   :  { %233 = vtanh.f32 %v137_v39 }
  0xa9   :  { %235 = vtanh.f32 %v134_v38 }
  0xaa   :  { %237 = vtanh.f32 %v131_v41 }
  0xab   :  { %239 = vtanh.f32 %v128_v42 }
  0xae   :  { %v234_v43 = vpop.eup %233 }
  0xaf   :  { %166 = vmatpush.msra.mxu1 %v234_v43  ;;  %196 = vmatpush.msra.mxu2 %v234_v43  ;;  %v236_v44 = vpop.eup %235 }
  0xb0   :  { %v238_v45 = vpop.eup %237 }
  0xb1   :  { %167 = vmatpush.msra.mxu1 %v236_v44  ;;  %197 = vmatpush.msra.mxu2 %v236_v44  ;;  %v240_v48 = vpop.eup %239 }
  0xb3   :  { %168 = vmatpush.msra.mxu1 %v238_v45  ;;  %198 = vmatpush.msra.mxu2 %v238_v45 }
  0xb5   :  { %169 = vmatpush.msra.mxu1 %v240_v48  ;;  %199 = vmatpush.msra.mxu2 %v240_v48 }
  0xb6   :  { %225 = vmatmul.msk.f32.vlgmr.msra.gmra.mxu1 %vm150_vm2, %v143_v46  ;;  %226 = vmatmul.msk.f32.vlgmr.msra.gmra.mxu2 %vm150_vm2, %v174_v47 }
 0x133   :  { %v171_v50 = vpop.f32.mrf.mxu1 }
 0x134   :  { %v172_v52 = vadd.f32 %v171_v50, %v148_v49 }
 0x136   :  { %v207_v53 = vmul.f32 %v206_v51, %v172_v52 }
 0x138   :  { %v208_v54 = vadd.f32 %v207_v53, %v334_v15 }
 0x139   :  { %v201_v56 = vpop.f32.mrf.mxu2 }
 0x13a   :  { %209 = vst [vmem:[%s390_s11] sm:$0xf] %v208_v54  ;;  %v202_v57 = vadd.f32 %v201_v56, %v179_v55 }
 0x13c   :  { %v210_v58 = vmul.f32 %v206_v51, %v202_v57 }
 0x13e   :  { %v211_v59 = vadd.f32 %v210_v58, %v337_v20 }
 0x140   :  { %212 = vst [vmem:[%s391_s12] sm:$0xf] %v211_v59 }

</bundles_post_ra>
